<compile_context>
chip_gen: v6e
topology: v6e:2x2x1
jax: 0.10.0
libtpu: 0.0.40
codegen_flags: <defaults>
</compile_context>

<pallas_src>
import jax
import jax.numpy as jnp
from jax.experimental import pallas as pl
from jax.experimental.pallas import tpu as pltpu

_LANE = 128
# Rough per-row VMEM bytes at f32: x block lane-padded 12->128 (512 B/row,
# double buffered), (16,tile)/(32,tile) intermediates, (1,tile) output
# (sublane-padded, double buffered), plus slack for Mosaic temporaries.
_VMEM_BYTES_PER_ROW = 1792
_VMEM_FIXED_BYTES = 6 << 20


def _mlp_kernel(x_ref, w1_ref, b1_ref, w2_ref, b2_ref, w3_ref, b3_ref, o_ref):
    # x_ref: (tile, 12).  Weights are PyTorch-layout (out, in); biases (out, 1).
    x = x_ref[...]

    # Layer 1: Linear(12 -> 16) + ReLU  -> (16, tile)
    # Contract x's feature dim directly (W1 @ X^T) so batch lands on lanes.
    h1 = jax.lax.dot_general(
        w1_ref[...], x, dimension_numbers=(((1,), (1,)), ((), ())),
        preferred_element_type=jnp.float32) + b1_ref[...]
    h1 = jnp.maximum(h1, 0.0)          # ReLU; Dropout(0.5) is identity at inference.

    # Layer 2: Linear(16 -> 32) + ReLU  -> (32, tile)
    h2 = jnp.dot(w2_ref[...], h1, preferred_element_type=jnp.float32) + b2_ref[...]
    h2 = jnp.maximum(h2, 0.0)          # Dropout(0.5): identity at inference.

    # Output layer: Linear(32 -> 1)     -> (1, tile), lane-dense store.
    out = jnp.dot(w3_ref[...], h2, preferred_element_type=jnp.float32) + b3_ref[...]
    o_ref[...] = out.astype(o_ref.dtype)


def _tpu_hw_info():
    """Best-effort (vmem_capacity_bytes, num_tensorcores); safe fallbacks."""
    vmem_bytes = 64 << 20   # conservative default (v7x per-core physical VMEM)
    num_cores = 1
    try:
        info = pltpu.get_tpu_info()
        v = getattr(info, "vmem_capacity_bytes", None)
        if v:
            vmem_bytes = int(v)
        for name in ("num_cores", "core_count", "num_tensorcores",
                     "tensorcore_count", "cores_per_chip"):
            c = getattr(info, name, None)
            if c:
                num_cores = max(1, int(c))
                break
    except Exception:
        pass
    return vmem_bytes, num_cores


def _run_tiles(x, params, *, tile, num_steps, vmem_limit_bytes):
    """Runs the MLP over rows [0, num_steps*tile) of x -> (1, num_steps*tile)."""
    w1, b1 = params["w1"], params["b1"]   # (16, 12), (16, 1)
    w2, b2 = params["w2"], params["b2"]   # (32, 16), (32, 1)
    w3, b3 = params["w3"], params["b3"]   # (1, 32),  (1, 1)

    rows = num_steps * tile
    weight_bytes = sum(int(a.size) * a.dtype.itemsize
                       for a in (w1, b1, w2, b2, w3, b3))
    cost = pl.CostEstimate(
        flops=2 * (12 * 16 + 16 * 32 + 32 * 1) * rows,
        transcendentals=0,
        bytes_accessed=rows * (12 + 1) * 4 + weight_bytes)

    # Weights/biases are tiny: every grid step gets the full array at a
    # constant block index (so Pallas keeps them resident, no per-step DMA).
    full = lambda a: pl.BlockSpec(a.shape, lambda i: (0, 0))

    return pl.pallas_call(
        _mlp_kernel,
        out_shape=jax.ShapeDtypeStruct((1, rows), jnp.float32),
        grid_spec=pltpu.PrefetchScalarGridSpec(
            num_scalar_prefetch=0,
            grid=(num_steps,),
            in_specs=[
                pl.BlockSpec((tile, 12), lambda i: (i, 0)),   # x batch tile
                full(w1), full(b1),
                full(w2), full(b2),
                full(w3), full(b3),
            ],
            out_specs=pl.BlockSpec((1, tile), lambda i: (0, i)),  # lane-dense
        ),
        compiler_params=pltpu.CompilerParams(
            dimension_semantics=("parallel",),
            vmem_limit_bytes=vmem_limit_bytes),
        cost_estimate=cost,
    )(x, w1, b1, w2, b2, w3, b3)


def electricity_net_forward(x, params, task: str = "regression", *, tb: int = 32768):
    """x: (B, 12) float32.  params: PyTorch-layout weights.  Returns (B, 1)."""
    B, D = x.shape
    assert D == 12

    if task == "classification":
        # softmax over the size-1 class dim is exactly 1.0 for every sample:
        # skip the kernel (and all of its HBM traffic) entirely.
        return jnp.ones((B, 1), dtype=jnp.float32)

    # ---- per-generation tile sizing -----------------------------------------
    vmem_bytes, num_cores = _tpu_hw_info()
    vmem_budget = min(vmem_bytes, 128 << 20) // 2          # leave ample headroom
    cap_rows = max(_LANE, (vmem_budget - _VMEM_FIXED_BYTES) // _VMEM_BYTES_PER_ROW)
    cap_groups = max(1, min(int(tb), int(cap_rows)) // _LANE)

    lane_groups = pl.cdiv(B, _LANE)
    tile_groups = max(1, min(cap_groups, lane_groups))
    if num_cores > 1 and lane_groups >= num_cores:
        # Multi-TensorCore parts (v7x): keep >= num_cores "parallel" grid steps
        # so every core gets a share of the batch.  Single-TC parts (v5e/v6e)
        # skip this and use one maximal tile.
        tile_groups = min(tile_groups, pl.cdiv(lane_groups, num_cores))
    tile = tile_groups * _LANE

    vmem_limit = int(max(32 << 20,
                         min(tile * _VMEM_BYTES_PER_ROW + _VMEM_FIXED_BYTES,
                             min(vmem_bytes, 128 << 20) - (4 << 20))))

    # ---- aligned bulk (no copy of x) + ragged tail (pad only the tail slice) -
    n_full = B // tile
    aligned = n_full * tile
    rem = B - aligned

    pieces = []
    if n_full > 0:
        # The grid only touches fully in-bounds (tile, 12) blocks of the
        # caller's x buffer; no padding / relayout pass over the whole array.
        bulk = _run_tiles(x, params, tile=tile, num_steps=n_full,
                          vmem_limit_bytes=vmem_limit)
        pieces.append(bulk[0])
    if rem > 0:
        tail_rows = int(pl.cdiv(rem, _LANE)) * _LANE
        x_tail = jnp.pad(x[aligned:], ((0, tail_rows - rem), (0, 0)))
        tail = _run_tiles(x_tail, params, tile=tail_rows, num_steps=1,
                          vmem_limit_bytes=vmem_limit)
        pieces.append(tail[0, :rem])

    out_flat = pieces[0] if len(pieces) == 1 else jnp.concatenate(pieces)
    return out_flat.reshape(B, 1)


def init_params(key):
    """PyTorch-layout parameters: Linear weights (out, in), biases (out, 1)."""
    k1, k2, k3, k4, k5, k6 = jax.random.split(key, 6)

    def uniform(k, shape, fan_in):
        bound = 1.0 / jnp.sqrt(fan_in)
        return jax.random.uniform(k, shape, jnp.float32, -bound, bound)

    return {
        "w1": uniform(k1, (16, 12), 12.0),
        "b1": uniform(k2, (16, 1), 12.0),
        "w2": uniform(k3, (32, 16), 16.0),
        "b2": uniform(k4, (32, 1), 16.0),
        "w3": uniform(k5, (1, 32), 32.0),
        "b3": uniform(k6, (1, 1), 32.0),
    }


def reference_forward(x, params, task):
    h1 = jnp.maximum(x @ params["w1"].T + params["b1"][:, 0], 0.0)
    h2 = jnp.maximum(h1 @ params["w2"].T + params["b2"][:, 0], 0.0)
    out = h2 @ params["w3"].T + params["b3"][:, 0]
    if task == "classification":
        out = jax.nn.softmax(out, axis=1)
    return out


if __name__ == "__main__":
    key = jax.random.PRNGKey(0)
    pkey, k_small, k_multi = jax.random.split(key, 3)
    params = init_params(pkey)

    # Small deterministic shapes:
    #   B=8              -> padded-tail-only path (single tiny call).
    #   B=300, tb=128    -> aligned bulk (2 x 128-row "parallel" grid steps,
    #                       no pad of x) + 44-row ragged tail + concat.
    cases = [(8, None, k_small), (300, 128, k_multi)]
    for B, tb, xkey in cases:
        x = jax.random.normal(xkey, (B, 12), dtype=jnp.float32)
        kwargs = {} if tb is None else {"tb": tb}

        out_reg = jax.block_until_ready(
            electricity_net_forward(x, params, task="regression", **kwargs))
        out_cls = jax.block_until_ready(
            electricity_net_forward(x, params, task="classification", **kwargs))

        ref_reg = reference_forward(x, params, "regression")
        ref_cls = reference_forward(x, params, "classification")
        assert out_reg.shape == (B, 1) and out_cls.shape == (B, 1)
        assert jnp.allclose(out_reg, ref_reg, atol=1e-5, rtol=1e-5)
        assert jnp.allclose(out_cls, ref_cls, atol=1e-5, rtol=1e-5)

    print("KERNEL_OK")
</pallas_src>

<mosaic_0001>
module attributes {stable_mosaic.version = 11 : i64} {
  func.func @_mlp_kernel(%arg0: i32, %arg1: memref<128x12xf32, #tpu.memory_space<vmem>>, %arg2: memref<16x12xf32, #tpu.memory_space<vmem>>, %arg3: memref<16x1xf32, #tpu.memory_space<vmem>>, %arg4: memref<32x16xf32, #tpu.memory_space<vmem>>, %arg5: memref<32x1xf32, #tpu.memory_space<vmem>>, %arg6: memref<1x32xf32, #tpu.memory_space<vmem>>, %arg7: memref<1x1xf32, #tpu.memory_space<vmem>>, %arg8: memref<1x128xf32, #tpu.memory_space<vmem>>) attributes {dimension_semantics = [#tpu.dimension_semantics<parallel>], iteration_bounds = array<i64: 1>, scalar_prefetch = 0 : i64, scratch_operands = 0 : i64, tpu.core_type = #tpu.core_type<tc>, window_params = [{transform_indices = @transform_0, window_bounds = array<i64: 128, 12>}, {pipeline_mode = #tpu.pipeline_mode<synchronous>, transform_indices = @transform_1, window_bounds = array<i64: 16, 12>}, {pipeline_mode = #tpu.pipeline_mode<synchronous>, transform_indices = @transform_2, window_bounds = array<i64: 16, 1>}, {pipeline_mode = #tpu.pipeline_mode<synchronous>, transform_indices = @transform_3, window_bounds = array<i64: 32, 16>}, {pipeline_mode = #tpu.pipeline_mode<synchronous>, transform_indices = @transform_4, window_bounds = array<i64: 32, 1>}, {pipeline_mode = #tpu.pipeline_mode<synchronous>, transform_indices = @transform_5, window_bounds = array<i64: 1, 32>}, {pipeline_mode = #tpu.pipeline_mode<synchronous>, transform_indices = @transform_6, window_bounds = array<i64: 1, 1>}, {transform_indices = @transform_7, window_bounds = array<i64: 1, 128>}]} {
    %c0 = arith.constant 0 : index
    %c0_0 = arith.constant 0 : index
    %0 = vector.load %arg1[%c0, %c0_0] : memref<128x12xf32, #tpu.memory_space<vmem>>, vector<128x12xf32>
    %c0_1 = arith.constant 0 : index
    %c0_2 = arith.constant 0 : index
    %1 = vector.load %arg2[%c0_1, %c0_2] : memref<16x12xf32, #tpu.memory_space<vmem>>, vector<16x12xf32>
    %cst = arith.constant dense<0.000000e+00> : vector<16x128xf32>
    %2 = tpu.matmul %1, %0, %cst {dimension_numbers = #tpu.dot_dimension_numbers<[1], [1], [0], [0], [0, 0, 1, 0], [], []>} : vector<16x12xf32>, vector<128x12xf32>, vector<16x128xf32> -> vector<16x128xf32>
    %c0_3 = arith.constant 0 : index
    %c0_4 = arith.constant 0 : index
    %3 = vector.load %arg3[%c0_3, %c0_4] : memref<16x1xf32, #tpu.memory_space<vmem>>, vector<16x1xf32>
    %4 = vector.broadcast %3 : vector<16x1xf32> to vector<16x128xf32>
    %5 = arith.addf %2, %4 : vector<16x128xf32>
    %cst_5 = arith.constant 0.000000e+00 : f32
    %6 = vector.broadcast %cst_5 : f32 to vector<16x128xf32>
    %7 = arith.maximumf %5, %6 : vector<16x128xf32>
    %c0_6 = arith.constant 0 : index
    %c0_7 = arith.constant 0 : index
    %8 = vector.load %arg4[%c0_6, %c0_7] : memref<32x16xf32, #tpu.memory_space<vmem>>, vector<32x16xf32>
    %cst_8 = arith.constant dense<0.000000e+00> : vector<32x128xf32>
    %9 = tpu.matmul %8, %7, %cst_8 {dimension_numbers = #tpu.dot_dimension_numbers<[1], [0], [0], [1], [0, 0, 1, 1], [], []>} : vector<32x16xf32>, vector<16x128xf32>, vector<32x128xf32> -> vector<32x128xf32>
    %c0_9 = arith.constant 0 : index
    %c0_10 = arith.constant 0 : index
    %10 = vector.load %arg5[%c0_9, %c0_10] : memref<32x1xf32, #tpu.memory_space<vmem>>, vector<32x1xf32>
    %11 = vector.broadcast %10 : vector<32x1xf32> to vector<32x128xf32>
    %12 = arith.addf %9, %11 : vector<32x128xf32>
    %cst_11 = arith.constant 0.000000e+00 : f32
    %13 = vector.broadcast %cst_11 : f32 to vector<32x128xf32>
    %14 = arith.maximumf %12, %13 : vector<32x128xf32>
    %c0_12 = arith.constant 0 : index
    %c0_13 = arith.constant 0 : index
    %15 = vector.load %arg6[%c0_12, %c0_13] : memref<1x32xf32, #tpu.memory_space<vmem>>, vector<1x32xf32>
    %cst_14 = arith.constant dense<0.000000e+00> : vector<1x128xf32>
    %16 = tpu.matmul %15, %14, %cst_14 {dimension_numbers = #tpu.dot_dimension_numbers<[1], [0], [0], [1], [0, 0, 1, 1], [], []>} : vector<1x32xf32>, vector<32x128xf32>, vector<1x128xf32> -> vector<1x128xf32>
    %c0_15 = arith.constant 0 : index
    %c0_16 = arith.constant 0 : index
    %17 = vector.load %arg7[%c0_15, %c0_16] : memref<1x1xf32, #tpu.memory_space<vmem>>, vector<1x1xf32>
    %18 = vector.broadcast %17 : vector<1x1xf32> to vector<1x128xf32>
    %19 = arith.addf %16, %18 : vector<1x128xf32>
    %c0_17 = arith.constant 0 : index
    %c0_18 = arith.constant 0 : index
    %20 = vector.load %arg8[%c0_17, %c0_18] : memref<1x128xf32, #tpu.memory_space<vmem>>, vector<1x128xf32>
    tpu.vector_store %arg8[%c0_17, %c0_18], %19 {strides = array<i32>} : memref<1x128xf32, #tpu.memory_space<vmem>>, vector<1x128xf32>,
    return
  }
  func.func @transform_0(%arg0: i32) -> (i32, i32) {
    %c0_i32 = arith.constant 0 : i32
    %c0_i32_0 = arith.constant 0 : i32
    return %arg0, %c0_i32 : i32, i32
  }
  func.func @transform_1(%arg0: i32) -> (i32, i32) {
    %c0_i32 = arith.constant 0 : i32
    %c0_i32_0 = arith.constant 0 : i32
    %c0_i32_1 = arith.constant 0 : i32
    return %c0_i32, %c0_i32_0 : i32, i32
  }
  func.func @transform_2(%arg0: i32) -> (i32, i32) {
    %c0_i32 = arith.constant 0 : i32
    %c0_i32_0 = arith.constant 0 : i32
    %c0_i32_1 = arith.constant 0 : i32
    return %c0_i32, %c0_i32_0 : i32, i32
  }
  func.func @transform_3(%arg0: i32) -> (i32, i32) {
    %c0_i32 = arith.constant 0 : i32
    %c0_i32_0 = arith.constant 0 : i32
    %c0_i32_1 = arith.constant 0 : i32
    return %c0_i32, %c0_i32_0 : i32, i32
  }
  func.func @transform_4(%arg0: i32) -> (i32, i32) {
    %c0_i32 = arith.constant 0 : i32
    %c0_i32_0 = arith.constant 0 : i32
    %c0_i32_1 = arith.constant 0 : i32
    return %c0_i32, %c0_i32_0 : i32, i32
  }
  func.func @transform_5(%arg0: i32) -> (i32, i32) {
    %c0_i32 = arith.constant 0 : i32
    %c0_i32_0 = arith.constant 0 : i32
    %c0_i32_1 = arith.constant 0 : i32
    return %c0_i32, %c0_i32_0 : i32, i32
  }
  func.func @transform_6(%arg0: i32) -> (i32, i32) {
    %c0_i32 = arith.constant 0 : i32
    %c0_i32_0 = arith.constant 0 : i32
    %c0_i32_1 = arith.constant 0 : i32
    return %c0_i32, %c0_i32_0 : i32, i32
  }
  func.func @transform_7(%arg0: i32) -> (i32, i32) {
    %c0_i32 = arith.constant 0 : i32
    %c0_i32_0 = arith.constant 0 : i32
    return %c0_i32, %arg0 : i32, i32
  }
}

</mosaic_0001>

<bundles_post_ra>
// kernel: tpu_custom_call.1
= control target key start
LH: loop header
LB: loop body
LE: loop exit
PB: predicated region body
PF: predicated region fallthrough
CT: control target
= control target key end

     0   :  { %s732_s0 = inlined_call_operand.vmem [shape: f32[128,12], index: 0, kind: input, shape index: {}]   ;;  %s733_s1 = inlined_call_operand.vmem [shape: f32[16,12], index: 1, kind: input, shape index: {}]   ;;  %s734_s2 = inlined_call_operand.vmem [shape: f32[16,1], index: 2, kind: input, shape index: {}]   ;;  %s735_s3 = inlined_call_operand.vmem [shape: f32[32,16], index: 3, kind: input, shape index: {}]   ;;  %s736_s4 = inlined_call_operand.vmem [shape: f32[32,1], index: 4, kind: input, shape index: {}]   ;;  %s737_s5 = inlined_call_operand.vmem [shape: f32[1,32], index: 5, kind: input, shape index: {}]   ;;  %s738_s6 = inlined_call_operand.<no memory space> [shape: f32[1,1], index: 6, kind: input, shape index: {}]   ;;  %s739_s7 = inlined_call_operand.hbm [shape: f32[1,128], index: 7, kind: output, shape index: {}]  }
   0x1   :  { %v12_v0 = vstv %s738_s6 }
   0x2   :  { %13 = vst [vmem:[#allocation2] sm:$0x1] %v12_v0 }
   0x3   :  { %v44_v1 = vld [vmem:[%s732_s0 + $0x78] sm:$0xff]  ;;  %vm59_vm0 = vcmask 97280   ;;  %v43_v2 = vld [vmem:[%s732_s0 + $0x70] sm:$0xff]  ;;  %v557_v3 = vmov 0   ;;  %v42_v4 = vld [vmem:[%s732_s0 + $0x68] sm:$0xff] }
   0x4   :  { %473 = vmatprep.subr.msk.mxu0 %vm59_vm0, %v44_v1  ;;  %533 = vset.pattern.permute.xlu0 %v557_v3  ;;  %v45_v5 = vld [vmem:[%s733_s1] sm:$0xff]  ;;  %v48_v6 = vld [vmem:[%s734_s2 + $0x8] sm:$0xff] }
   0x5   :  { %474 = vmatpush3.xpose.msk.msra.mxu0 %vm59_vm0, %v44_v1  ;;  %534 = vset.pattern.permute.xlu1 %v557_v3 }
   0x6   :  { %475 = vmatprep.subr.msk.mxu0 %vm59_vm0, %v43_v2  ;;  %505 = vmatprep.mubr.msk.f32.mxu0 %vm59_vm0, %v45_v5 }
   0x7   :  { %56 = vperm.xlu0 %533, %v48_v6  }
   0x9   :  { %476 = vmatpush3.xpose.msk.msra.mxu0 %vm59_vm0, %v43_v2 }
   0xa   :  { %477 = vmatprep.subr.msk.mxu0 %vm59_vm0, %v42_v4 }
   0xb   :  { %14 = vsyncpa [#allocation4], 0  ;;  %v41_v7 = vld [vmem:[%s732_s0 + $0x60] sm:$0xff]  ;;  %v40_v9 = vld [vmem:[%s732_s0 + $0x58] sm:$0xff]  ;;  %vm219_vm1 = vcmask 130048   ;;  %v558_v39 = vmov 0.0   ;;  %v328_v57 = vlaneseq }
   0xc   :  { %v47_v8 = vld [vmem:[%s734_s2] sm:$0xff]  ;;  %v196_v10 = vld [vmem:[%s736_s4 + $0x8] sm:$0xff]  ;;  %v39_v11 = vld [vmem:[%s732_s0 + $0x50] sm:$0xff]  ;;  %vm559_vm2 = vmmov 0   ;;  %vm332_vm3 = vcmask 261120   ;;  %s560_s6 = smov [#allocation3]  }
   0xd   :  { %478 = vmatpush3.xpose.msk.msra.mxu0 %vm59_vm0, %v42_v4  ;;  %51 = vperm.xlu0 %533, %v47_v8   ;;  %v322_v12 = vld [vmem:[#allocation2] sm:$0x1]  ;;  %v38_v13 = vld [vmem:[%s732_s0 + $0x48] sm:$0xff]  ;;  %v36_v15 = vld [vmem:[%s732_s0 + $0x38] sm:$0xff]  ;;  %v329_v58 = vshrl.u32 %v328_v57, 7  ;;  %s413_s30 = sshll.u32 %s560_s6, 4  ;;  %s414_s30 = int_to_ptr.vmem [resolvable:$true] %s413_s30 }
   0xe   :  { %479 = vmatprep.subr.msk.mxu0 %vm59_vm0, %v41_v7  ;;  %v37_v14 = vld [vmem:[%s732_s0 + $0x40] sm:$0xff]  ;;  %v35_v16 = vld [vmem:[%s732_s0 + $0x30] sm:$0xff]  ;;  %v34_v17 = vld [vmem:[%s732_s0 + $0x28] sm:$0xff]  ;;  %s535_s8 = scalar_lea.vmem %s414_s30, 16  ;;  %s539_s9 = scalar_lea.vmem %s414_s30, 32 }
   0xf   :  { %v33_v18 = vld [vmem:[%s732_s0 + $0x20] sm:$0xff]  ;;  %v32_v19 = vld [vmem:[%s732_s0 + $0x18] sm:$0xff]  ;;  %v31_v20 = vld [vmem:[%s732_s0 + $0x10] sm:$0xff]  ;;  %v330_v59 = vsub.s32 0, %v329_v58  ;;  %p536_p0 = scmp.ne.s32.totalorder %s414_s30, %s535_s8  ;;  %p540_p1 = scmp.lt.s32.totalorder %s414_s30, %s414_s30 }
  0x10   :  { %v30_v21 = vld [vmem:[%s732_s0 + $0x8] sm:$0xff]  ;;  %v29_v22 = vld [vmem:[%s732_s0] sm:$0xff]  ;;  %v198_v25 = vld [vmem:[%s736_s4 + $0x18] sm:$0xff]  ;;  %p541_p2 = scmp.lt.s32.totalorder %s539_s9, %s535_s8 }
  0x11   :  { %480 = vmatpush3.xpose.msk.msra.mxu0 %vm59_vm0, %v41_v7  ;;  %206 = vperm.xlu0 %533, %v196_v10   ;;  %v46_v23 = vld [vmem:[%s733_s1 + $0x8] sm:$0xff]  ;;  %v191_v24 = vld [vmem:[%s735_s3] sm:$0xff]  ;;  %v197_v26 = vld [vmem:[%s736_s4 + $0x10] sm:$0xff] }
  0x12   :  { %481 = vmatprep.subr.msk.mxu0 %vm59_vm0, %v40_v9  ;;  %512 = vmatprep.mubr.msk.f32.mxu1 %vm219_vm1, %v191_v24  ;;  %v195_v27 = vld [vmem:[%s736_s4] sm:$0xff]  ;;  %v192_v36 = vld [vmem:[%s735_s3 + $0x8] sm:$0xff]  ;;  %v193_v37 = vld [vmem:[%s735_s3 + $0x10] sm:$0xff]  ;;  %p542_p3 = por %p541_p2, %p540_p1 }
  0x13   :  { %216 = vperm.xlu1 %534, %v198_v25   ;;  %v194_v38 = vld [vmem:[%s735_s3 + $0x18] sm:$0xff]  ;;  %v321_v56 = vld [vmem:[%s737_s5] sm:$0x1] }
  0x14   :  { %p543_p4 = pnand %p542_p3, %p536_p0 }
  0x15   :  { %482 = vmatpush3.xpose.msk.msra.mxu0 %vm59_vm0, %v40_v9  ;;  %325 = vperm.xlu0 %533, %v322_v12  }
  0x16   :  { %483 = vmatprep.subr.msk.mxu0 %vm59_vm0, %v39_v11 }
  0x17   :  { %211 = vperm.xlu1 %534, %v197_v26  }
  0x19   :  { %484 = vmatpush3.xpose.msk.msra.mxu0 %vm59_vm0, %v39_v11 }
  0x1a   :  { %485 = vmatprep.subr.msk.mxu0 %vm59_vm0, %v38_v13 }
  0x1b   :  { %201 = vperm.xlu1 %534, %v195_v27  }
  0x1d   :  { %486 = vmatpush3.xpose.msk.msra.mxu0 %vm59_vm0, %v38_v13 }
  0x1e   :  { %487 = vmatprep.subr.msk.mxu0 %vm59_vm0, %v37_v14 }
  0x21   :  { %488 = vmatpush3.xpose.msk.msra.mxu0 %vm59_vm0, %v37_v14 }
  0x22   :  { %489 = vmatprep.subr.msk.mxu0 %vm59_vm0, %v36_v15 }
  0x25   :  { %490 = vmatpush3.xpose.msk.msra.mxu0 %vm59_vm0, %v36_v15 }
  0x26   :  { %491 = vmatprep.subr.msk.mxu0 %vm59_vm0, %v35_v16 }
  0x29   :  { %492 = vmatpush3.xpose.msk.msra.mxu0 %vm59_vm0, %v35_v16 }
  0x2a   :  { %493 = vmatprep.subr.msk.mxu0 %vm59_vm0, %v34_v17 }
  0x2d   :  { %494 = vmatpush3.xpose.msk.msra.mxu0 %vm59_vm0, %v34_v17 }
  0x2e   :  { %495 = vmatprep.subr.msk.mxu0 %vm59_vm0, %v33_v18 }
  0x31   :  { %496 = vmatpush3.xpose.msk.msra.mxu0 %vm59_vm0, %v33_v18 }
  0x32   :  { %497 = vmatprep.subr.msk.mxu0 %vm59_vm0, %v32_v19 }
  0x35   :  { %498 = vmatpush3.xpose.msk.msra.mxu0 %vm59_vm0, %v32_v19 }
  0x36   :  { %499 = vmatprep.subr.msk.mxu0 %vm59_vm0, %v31_v20 }
  0x39   :  { %500 = vmatpush3.xpose.msk.msra.mxu0 %vm59_vm0, %v31_v20 }
  0x3a   :  { %501 = vmatprep.subr.msk.mxu0 %vm59_vm0, %v30_v21 }
  0x3d   :  { %502 = vmatpush3.xpose.msk.msra.mxu0 %vm59_vm0, %v30_v21 }
  0x3e   :  { %503 = vmatprep.subr.msk.mxu0 %vm59_vm0, %v29_v22 }
  0x41   :  { %504 = vmatpush3.xpose.msk.msra.mxu0 %vm59_vm0, %v29_v22 }
  0x44   :  { %506 = vmatmul.mubr.msk.f32.vlgmr.msra.gmra.mxu0 %vm59_vm0, %v46_v23 }
  0x82   :  { %v57_v28 = vpop.permute.xlu0 %56 }
  0x88   :  { %v52_v31 = vpop.permute.xlu0 %51 }
  0x8c   :  { %v207_v45 = vpop.permute.xlu0 %206 }
  0x8e   :  { %v217_v40 = vpop.permute.xlu1 %216 }
  0x90   :  { %v326_v60 = vpop.permute.xlu0 %325 }
  0x91   :  { %v331_v61 = vrot.slane %v326_v60, %v330_v59 }
  0x92   :  { %v212_v41 = vpop.permute.xlu1 %211 }
  0x96   :  { %v202_v47 = vpop.permute.xlu1 %201 }
 0x104   :  { %v507_v29 = vpop.f32.mrf.mxu0 }
 0x105   :  { %v186_v30 = vadd.f32 %v507_v29, %v57_v28 }
 0x106   :  { %v180_v32 = vpop.f32.mrf.mxu0 }
 0x107   :  { %v190_v33 = vmax.f32 %v186_v30, 0.0  ;;  %v181_v34 = vadd.f32 %v180_v32, %v52_v31 }
 0x109   :  { %v189_v35 = vmax.f32 %v181_v34, 0.0  ;;  %508 = vmatprep.subr.mxu1 %v190_v33 }
 0x10a   :  { %509 = vmatpush3.msra.mxu1 %v190_v33 }
 0x10b   :  { %510 = vmatprep.subr.mxu1 %v189_v35 }
 0x10c   :  { %511 = vmatpush3.msra.mxu1 %v189_v35 }
 0x10d   :  { %513 = vmatmul.mubr.msk.f32.vlgmr.msra.gmra.mxu1 %vm219_vm1, %v192_v36  ;;  %518 = vmatprep.subr.mxu1 %v558_v39 }
 0x10e   :  { %515 = vmatprep.mubr.msk.f32.mxu1 %vm219_vm1, %v193_v37 }
 0x111   :  { %516 = vmatmul.mubr.msk.f32.gmra.mxu1 %vm219_vm1, %v194_v38 }
 0x112   :  { %526 = vmatprep.mubr.msk.f32.mxu1 %vm559_vm2, %v558_v39 }
 0x1cd   :  { %v514_v42 = vpop.f32.mrf.mxu1 }
 0x1ce   :  { %v304_v49 = vadd.f32 %v514_v42, %v207_v45 }
 0x1cf   :  { %v298_v43 = vpop.f32.mrf.mxu1 }
 0x1d0   :  { %v299_v52 = vadd.f32 %v298_v43, %v202_v47  ;;  %v318_v54 = vmax.f32 %v304_v49, 0.0 }
 0x1d1   :  { %v517_v44 = vpop.f32.mrf.mxu1 }
 0x1d2   :  { %v314_v46 = vadd.f32 %v517_v44, %v217_v40  ;;  %v317_v55 = vmax.f32 %v299_v52, 0.0 }
 0x1d3   :  { %v308_v48 = vpop.f32.mrf.mxu1 }
 0x1d4   :  { %v320_v50 = vmax.f32 %v314_v46, 0.0  ;;  %v309_v51 = vadd.f32 %v308_v48, %v212_v41 }
 0x1d6   :  { %v319_v53 = vmax.f32 %v309_v51, 0.0  ;;  %519 = vmatpush3.msra.mxu1 %v320_v50 }
 0x1d7   :  { %520 = vmatprep.subr.mxu1 %v558_v39 }
 0x1d8   :  { %521 = vmatpush3.msra.mxu1 %v319_v53 }
 0x1d9   :  { %522 = vmatprep.subr.mxu1 %v558_v39 }
 0x1da   :  { %523 = vmatpush3.msra.mxu1 %v318_v54 }
 0x1db   :  { %524 = vmatprep.subr.mxu1 %v558_v39 }
 0x1dc   :  { %525 = vmatpush3.msra.mxu1 %v317_v55 }
 0x1dd   :  { %527 = vmatmul.mubr.msk.f32.vlgmr.msra.gmra.mxu1 %vm332_vm3, %v321_v56 }
 0x29d   :  { %v402_v62 = vpop.f32.mrf.mxu1 }
 0x29e   :  { %v403_v63 = vadd.f32 %v402_v62, %v331_v61 }
 0x29f   :  { %v528_v0 = vpop.f32.mrf.mxu1 }
 0x2a0   :  { %406 = vst [vmem:[#allocation3] sm:$0x1] %v403_v63 }
 0x2a1   :  { %546 = shalt.err (!%p543_p4)
}
 0x2a2   :  { %416 = dma.vmem_to_hbm [thread:$0]  %s414_s30, 16, %s739_s7, [#allocation4]  }
 0x2a3   :  { %555 = dma.done.wait [#allocation4], 16  }
 0x2a4   :  { %556 = vsyncadd [#allocation4], 4294967280 }
 0x2a5   :  { %420 = vsyncpa [#allocation4], 1 }

</bundles_post_ra>
